<compile_context>
chip_gen: v7x
topology: tpu7x:2x2x1
jax: 0.10.0
libtpu: 0.0.40
codegen_flags: <defaults>
</compile_context>

<pallas_src>
import functools

import numpy as np
import jax
import jax.numpy as jnp
from jax.experimental import pallas as pl
from jax.experimental.pallas import tpu as pltpu


def _round_up(a, m):
    return ((a + m - 1) // m) * m


def _pe_kernel(xt_ref, ot_ref, *, num_freqs, d_in, freq_factor, include_input):
    """Transposed tile: xt_ref (d_in, tb) -> ot_ref (d_out, tb); batch on lanes."""
    x = xt_ref[...].astype(jnp.float32)                  # (d_in, tb) in f32
    half_pi = np.float32(np.pi * 0.5)

    pieces = []
    if include_input:
        pieces.append(x)

    if num_freqs > 0:
        # Stack all 2*num_freqs*d_in argument rows, then ONE jnp.sin over the whole slab
        # (lane-dense, ~full vreg occupancy on the EUP).  Frequencies are compile-time
        # scalar immediates; cosine rows are sin(x*f + pi/2), exactly like the torch ref.
        freq_parts = []
        for f in range(num_freqs):
            xf = x * np.float32(freq_factor * (2.0 ** f))   # scalar-immediate mul (VPU)
            freq_parts.append(xf)                           # phase 0
            freq_parts.append(xf + half_pi)                 # phase pi/2
        arg = jnp.concatenate(freq_parts, axis=0)            # (2F*d_in, tb)
        pieces.append(jnp.sin(arg))                          # single EUP pass

    full = pieces[0] if len(pieces) == 1 else jnp.concatenate(pieces, axis=0)
    ot_ref[...] = full.astype(ot_ref.dtype)                  # one aligned, lane-dense store


def positional_encoding_t(x, num_freqs=6, freq_factor=float(np.pi), include_input=True):
    """Lane-dense primary API: (B, d_in) -> (d_out, B) (transposed encoding).

    This is the layout the kernel writes natively (batch on lanes) and the layout a
    downstream (H, d_out) weight matmul wants as its contracting operand.
    """
    B, d_in = x.shape
    dtype = x.dtype
    d_out = 2 * num_freqs * d_in + (d_in if include_input else 0)

    # --- Tile selection --------------------------------------------------------------
    # Big lane tiles amortize the ~0.35 us per-grid-step overhead; cap at 16K lanes
    # (double-buffered in+out footprint ~5.6 MiB f32, well under scoped VMEM on
    # v5e/v6e/v7x).  For large batches split into up to ~8 steps (at least 4096 lanes
    # each) so v7x's two TensorCores both get work via the "parallel" grid axis.
    B128 = _round_up(B, 128)
    tb = min(B128, 16384, max(4096, _round_up(pl.cdiv(B128, 8), 128)))
    grid = (pl.cdiv(B, tb),)

    # Tiny input relayout (d_in rows only); see header comment for why this stays in XLA.
    xt = x.T                                             # (d_in, B)

    kernel = functools.partial(
        _pe_kernel,
        num_freqs=num_freqs,
        d_in=d_in,
        freq_factor=float(freq_factor),
        include_input=include_input,
    )

    itemsize = jnp.dtype(dtype).itemsize
    cost = pl.CostEstimate(
        flops=3 * num_freqs * d_in * B,                       # scalar mul + phase add
        transcendentals=2 * num_freqs * d_in * B,             # one sin per embed element
        bytes_accessed=(d_in + d_out) * B * itemsize,
    )

    return pl.pallas_call(
        kernel,
        out_shape=jax.ShapeDtypeStruct((d_out, B), dtype),
        grid=grid,
        in_specs=[pl.BlockSpec((d_in, tb), lambda i: (0, i))],
        out_specs=pl.BlockSpec((d_out, tb), lambda i: (0, i)),
        compiler_params=pltpu.CompilerParams(
            dimension_semantics=("parallel",),
            vmem_limit_bytes=32 * 1024 * 1024,   # explicit: v5e's default scoped VMEM is 16 MiB
        ),
        cost_estimate=cost,
    )(xt)


def positional_encoding(x, num_freqs=6, freq_factor=float(np.pi), include_input=True):
    """Module-compatible API: (B, d_in) -> (B, d_out), matching torch's forward.

    Note: the final .T is an extra HBM pass over the output done by XLA.  On a
    memory-bound pipeline, prefer `positional_encoding_t` and consume the (d_out, B)
    layout directly (e.g. as the contracting operand of the next MLP matmul).
    """
    return positional_encoding_t(
        x, num_freqs=num_freqs, freq_factor=freq_factor, include_input=include_input
    ).T


def positional_encoding_ref(x, num_freqs=6, freq_factor=float(np.pi), include_input=True):
    """Pure-JAX reference mirroring the torch forward exactly."""
    B, d_in = x.shape
    freqs = freq_factor * 2.0 ** jnp.arange(num_freqs, dtype=x.dtype)
    freqs_rep = jnp.repeat(freqs, 2).reshape(1, -1, 1)                       # (1, 2F, 1)
    phases = jnp.zeros((2 * num_freqs,), x.dtype).at[1::2].set(np.pi * 0.5)
    phases = phases.reshape(1, -1, 1)                                        # (1, 2F, 1)
    embed = jnp.tile(x[:, None, :], (1, 2 * num_freqs, 1))                   # (B, 2F, d_in)
    embed = jnp.sin(phases + embed * freqs_rep).reshape(B, -1)
    if include_input:
        embed = jnp.concatenate([x, embed], axis=-1)
    return embed


if __name__ == "__main__":
    num_freqs, d_in = 6, 3
    d_out = 2 * num_freqs * d_in + d_in

    # Small shape consistent with the torch module: (batch, d_in).
    x = jax.random.normal(jax.random.PRNGKey(0), (8, d_in), dtype=jnp.float32)
    out = jax.block_until_ready(positional_encoding(x, num_freqs=num_freqs))
    ref = positional_encoding_ref(x, num_freqs=num_freqs)
    assert out.shape == (8, d_out), out.shape
    # Kernel-side sin (EUP path) vs XLA's sin can differ at ulp level for |arg| up to
    # ~|x|*pi*2^(F-1); 5e-4 is comfortably above that but still tight for O(1) outputs.
    np.testing.assert_allclose(np.asarray(out), np.asarray(ref), rtol=5e-4, atol=5e-4)

    # Lane-dense primary API (no output transpose) — what downstream matmuls should consume.
    out_t = jax.block_until_ready(positional_encoding_t(x, num_freqs=num_freqs))
    assert out_t.shape == (d_out, 8), out_t.shape
    np.testing.assert_allclose(np.asarray(out_t), np.asarray(ref).T, rtol=5e-4, atol=5e-4)

    # Non-multiple-of-128 batch exercises the Pallas partial-block path (no explicit pad).
    x2 = jax.random.normal(jax.random.PRNGKey(1), (200, d_in), dtype=jnp.float32)
    out2 = jax.block_until_ready(positional_encoding(x2, num_freqs=num_freqs))
    ref2 = positional_encoding_ref(x2, num_freqs=num_freqs)
    assert out2.shape == (200, d_out), out2.shape
    np.testing.assert_allclose(np.asarray(out2), np.asarray(ref2), rtol=5e-4, atol=5e-4)

    print("KERNEL_OK")
</pallas_src>

<mosaic_0001>
module attributes {stable_mosaic.version = 11 : i64} {
  func.func @_pe_kernel(%arg0: i32, %arg1: memref<3x128xf32, #tpu.memory_space<vmem>>, %arg2: memref<39x128xf32, #tpu.memory_space<vmem>>) attributes {dimension_semantics = [#tpu.dimension_semantics<parallel>], iteration_bounds = array<i64: 1>, scalar_prefetch = 0 : i64, scratch_operands = 0 : i64, tpu.core_type = #tpu.core_type<tc>, window_params = [{transform_indices = @transform_0, window_bounds = array<i64: 3, 128>}, {transform_indices = @transform_1, window_bounds = array<i64: 39, 128>}]} {
    %c0 = arith.constant 0 : index
    %c0_0 = arith.constant 0 : index
    %0 = vector.load %arg1[%c0, %c0_0] : memref<3x128xf32, #tpu.memory_space<vmem>>, vector<3x128xf32>
    %cst = arith.constant 3.14159274 : f32
    %1 = vector.broadcast %cst : f32 to vector<3x128xf32>
    %2 = arith.mulf %0, %1 : vector<3x128xf32>
    %cst_1 = arith.constant 1.57079637 : f32
    %3 = vector.broadcast %cst_1 : f32 to vector<3x128xf32>
    %4 = arith.addf %2, %3 : vector<3x128xf32>
    %cst_2 = arith.constant 6.28318548 : f32
    %5 = vector.broadcast %cst_2 : f32 to vector<3x128xf32>
    %6 = arith.mulf %0, %5 : vector<3x128xf32>
    %cst_3 = arith.constant 1.57079637 : f32
    %7 = vector.broadcast %cst_3 : f32 to vector<3x128xf32>
    %8 = arith.addf %6, %7 : vector<3x128xf32>
    %cst_4 = arith.constant 12.566371 : f32
    %9 = vector.broadcast %cst_4 : f32 to vector<3x128xf32>
    %10 = arith.mulf %0, %9 : vector<3x128xf32>
    %cst_5 = arith.constant 1.57079637 : f32
    %11 = vector.broadcast %cst_5 : f32 to vector<3x128xf32>
    %12 = arith.addf %10, %11 : vector<3x128xf32>
    %cst_6 = arith.constant 25.1327419 : f32
    %13 = vector.broadcast %cst_6 : f32 to vector<3x128xf32>
    %14 = arith.mulf %0, %13 : vector<3x128xf32>
    %cst_7 = arith.constant 1.57079637 : f32
    %15 = vector.broadcast %cst_7 : f32 to vector<3x128xf32>
    %16 = arith.addf %14, %15 : vector<3x128xf32>
    %cst_8 = arith.constant 50.2654839 : f32
    %17 = vector.broadcast %cst_8 : f32 to vector<3x128xf32>
    %18 = arith.mulf %0, %17 : vector<3x128xf32>
    %cst_9 = arith.constant 1.57079637 : f32
    %19 = vector.broadcast %cst_9 : f32 to vector<3x128xf32>
    %20 = arith.addf %18, %19 : vector<3x128xf32>
    %cst_10 = arith.constant 100.530968 : f32
    %21 = vector.broadcast %cst_10 : f32 to vector<3x128xf32>
    %22 = arith.mulf %0, %21 : vector<3x128xf32>
    %cst_11 = arith.constant 1.57079637 : f32
    %23 = vector.broadcast %cst_11 : f32 to vector<3x128xf32>
    %24 = arith.addf %22, %23 : vector<3x128xf32>
    %25 = tpu.concatenate %2, %4, %6, %8, %10, %12, %14, %16, %18, %20, %22, %24 in 0 : vector<3x128xf32>, vector<3x128xf32>, vector<3x128xf32>, vector<3x128xf32>, vector<3x128xf32>, vector<3x128xf32>, vector<3x128xf32>, vector<3x128xf32>, vector<3x128xf32>, vector<3x128xf32>, vector<3x128xf32>, vector<3x128xf32> -> vector<36x128xf32>
    %26 = math.sin %25 : vector<36x128xf32>
    %27 = tpu.concatenate %0, %26 in 0 : vector<3x128xf32>, vector<36x128xf32> -> vector<39x128xf32>
    %c0_12 = arith.constant 0 : index
    %c0_13 = arith.constant 0 : index
    %28 = vector.load %arg2[%c0_12, %c0_13] : memref<39x128xf32, #tpu.memory_space<vmem>>, vector<39x128xf32>
    tpu.vector_store %arg2[%c0_12, %c0_13], %27 {strides = array<i32>} : memref<39x128xf32, #tpu.memory_space<vmem>>, vector<39x128xf32>,
    return
  }
  func.func @transform_0(%arg0: i32) -> (i32, i32) {
    %c0_i32 = arith.constant 0 : i32
    %c0_i32_0 = arith.constant 0 : i32
    return %c0_i32, %arg0 : i32, i32
  }
  func.func @transform_1(%arg0: i32) -> (i32, i32) {
    %c0_i32 = arith.constant 0 : i32
    %c0_i32_0 = arith.constant 0 : i32
    return %c0_i32, %arg0 : i32, i32
  }
}

</mosaic_0001>

<bundles_post_ra>
// kernel: tpu_custom_call.1
= control target key start
LH: loop header
LB: loop body
LE: loop exit
PB: predicated region body
PF: predicated region fallthrough
CT: control target
= control target key end

     0   :  { %6 = vsyncpa [#allocation3], 0  ;;  %s721_s6 = smov [#allocation2]   ;;  %s1191_s0 = inlined_call_operand.hbm [shape: f32[3,8], index: 0, kind: input, shape index: {}]   ;;  %s1192_s1 = inlined_call_operand.vmem [shape: f32[39,8], index: 1, kind: output, shape index: {}]  }
   0x1   :  { %s13_s7 = sshll.u32 %s721_s6, 4  ;;  %s697_s10 = scalar_lea.hbm %s1191_s0, 64  ;;  %s14_s7 = int_to_ptr.vmem [resolvable:$true] %s13_s7 }
   0x2   :  { %p698_p0 = scmp.ne.s32.totalorder %s1191_s0, %s697_s10  ;;  %p701_p1 = scmp.lt.u32.totalorder %s697_s10, %s1191_s0 }
   0x4   :  { %p703_p2 = pnand %p701_p1, %p698_p0 }
   0x6   :  { %706 = shalt.err (!%p703_p2)
}
   0x7   :  { %s707_s15 = scalar_lea.vmem %s14_s7, 64  ;;  %p712_p4 = scmp.lt.s32.totalorder %s14_s7, %s14_s7 }
   0x8   :  { %p708_p3 = scmp.ne.s32.totalorder %s14_s7, %s707_s15  ;;  %p713_p5 = scmp.lt.s32.totalorder %s707_s15, %s707_s15 }
   0xa   :  { %p714_p6 = por %p713_p5, %p712_p4 }
   0xc   :  { %p715_p7 = pnand %p714_p6, %p708_p3 }
   0xe   :  { %718 = shalt.err (!%p715_p7)
}
   0xf   :  { %16 = dma.hbm_to_vmem [thread:$0]  %s1191_s0, 64, %s14_s7, [#allocation3]  }
  0x10   :  { %719 = dma.done.wait [#allocation3], 64  }
  0x11   :  { %720 = vsyncadd [#allocation3], 4294967232  ;;  %v750_v0 = vld [vmem:[#allocation2] sm:$0x7]  ;;  %vm63_vm0 = vcmask 1042432   ;;  %vm65_vm1 = vcmask 1045504  }
  0x12   :  { %v21_v1 = vmul.f32 3.1415927, %v750_v0  ;;  %v23_v2 = vmul.f32 6.2831855, %v750_v0  ;;  %v25_v3 = vmul.f32 12.566371, %v750_v0 }
  0x13   :  { %v27_v4 = vmul.f32 25.132742, %v750_v0  ;;  %vm67_vm2 = vcmask 1040384   ;;  %v29_v9 = vmul.f32 50.265484, %v750_v0  ;;  %vm69_vm3 = vcmask 1043456  }
  0x14   :  { %v22_v5 = vadd.f32 1.5707964, %v21_v1  ;;  %v24_v6 = vadd.f32 1.5707964, %v23_v2  ;;  %v26_v7 = vadd.f32 1.5707964, %v25_v3 }
  0x15   :  { %v28_v8 = vadd.f32 1.5707964, %v27_v4  ;;  %vm73_vm4 = vcmask 1041408   ;;  %v37_v11 = vrot.slane %v23_v2, 2  ;;  %v43_v13 = vrot.slane %v25_v3, 4 }
  0x16   :  { %v34_v10 = vrot.slane %v22_v5, 5  ;;  %v40_v12 = vrot.slane %v24_v6, 7  ;;  %v46_v14 = vrot.slane %v26_v7, 1  ;;  %v49_v15 = vrot.slane %v27_v4, 6 }
  0x17   :  { %v52_v16 = vrot.slane %v28_v8, 3  ;;  %vm71_vm5 = vcmask 1046528   ;;  %vm75_vm6 = vcmask 1044480   ;;  %v30_v19 = vadd.f32 1.5707964, %v29_v9 }
  0x18   :  { %v64_v17 = vsel %vm63_vm0, %v21_v1, %v34_v10  ;;  %v68_v18 = vsel %vm67_vm2, %v37_v11, %v40_v12  ;;  %v74_v22 = vsel %vm73_vm4, %v46_v14, %v49_v15  ;;  %v773_v32 = vmul.f32 100.53097, %v750_v0 }
  0x19   :  { %v760_v20 = vsel %vm65_vm1, %v64_v17, %v37_v11  ;;  %v70_v21 = vsel %vm69_vm3, %v68_v18, %v43_v13  ;;  %v764_v24 = vsel %vm75_vm6, %v74_v22, %v52_v16  ;;  %v55_v29 = vrot.slane %v30_v19, 5 }
  0x1a   :  { %v762_v23 = vsel %vm71_vm5, %v70_v21, %v46_v14  ;;  %v80_v25 = vand.u32 2147483647, %v760_v20  ;;  %v83_v26 = vand.u32 2139095040, %v760_v20  ;;  %v291_v35 = vand.u32 2139095040, %v764_v24 }
  0x1b   :  { %v184_v27 = vand.u32 2147483647, %v762_v23  ;;  %v187_v28 = vand.u32 2139095040, %v762_v23  ;;  %v58_v37 = vrot.slane %v773_v32, 2  ;;  %v77_v40 = vsel %vm63_vm0, %v29_v9, %v55_v29 }
  0x1c   :  { %v84_v30 = vshrl.u32 %v83_v26, 23  ;;  %v87_v31 = vand.u32 8388607, %v80_v25  ;;  %v292_v39 = vshrl.u32 %v291_v35, 23  ;;  %v288_v45 = vand.u32 2147483647, %v764_v24 }
  0x1d   :  { %v188_v33 = vshrl.u32 %v187_v28, 23  ;;  %v191_v34 = vand.u32 8388607, %v184_v27  ;;  %v782_v47 = vadd.f32 1.5707964, %v773_v32  ;;  %v787_v48 = vsel %vm65_vm1, %v77_v40, %v58_v37 }
  0x1e   :  { %v630_v36 = vadd.s32 4294967169, %v84_v30  ;;  %v88_v41 = vor.u32 8388608, %v87_v31  ;;  %v638_v46 = vadd.s32 4294967169, %v292_v39  ;;  %v795_v56 = vand.u32 8388607, %v288_v45 }
  0x1f   :  { %v634_v38 = vadd.s32 4294967169, %v188_v33  ;;  %v192_v43 = vor.u32 8388608, %v191_v34  ;;  %v722_v59 = vmov 683565275   ;;  %v723_v61 = vmov 2475754826  }
  0x20   :  { %v90_v42 = vadd.s32 1, %v630_v36  ;;  %v789_v52 = vshll.u32 %v88_v41, 8  ;;  %v797_v57 = vadd.s32 1, %v638_v46  ;;  %v724_v63 = vmov 2131351028  }
  0x21   :  { %v194_v44 = vadd.s32 1, %v634_v38  ;;  %v791_v55 = vshll.u32 %v192_v43, 8  ;;  %v725_v2 = vmov 2102212464   ;;  %v726_v4 = vmov 920167782  }
  0x22   :  { %vm91_vm7 = vcmp.gt.s32.totalorder %v90_v42, 0  ;;  %v727_v12 = vmov 1326507024   ;;  %vm299_vm13 = vcmp.gt.s32.totalorder %v797_v57, 0  ;;  %vm82_vm6 = vcmp.lt.s32.totalorder %v760_v20, 0 }
  0x23   :  { %v92_v49 = vsel %vm91_vm7, %v90_v42, 0  ;;  %vm195_vm8 = vcmp.gt.s32.totalorder %v194_v44, 0 }
  0x24   :  { %v93_v50 = vshrl.u32 %v92_v49, 5  ;;  %v94_v51 = vand.u32 31, %v92_v49  ;;  %v196_v53 = vsel %vm195_vm8, %v194_v44, 0 }
  0x25   :  { %v198_v54 = vand.u32 31, %v196_v53  ;;  %v804_v6 = vshrl.u32 %v196_v53, 5 }
  0x26   :  { %v95_v58 = vsub.s32 32, %v94_v51  ;;  %v97_v60 = vshll.u32 %v722_v59, %v94_v51  ;;  %v100_v62 = vshll.u32 %v723_v61, %v94_v51  ;;  %v103_v1 = vshll.u32 %v724_v63, %v94_v51 }
  0x27   :  { %v106_v3 = vshll.u32 %v725_v2, %v94_v51  ;;  %v109_v5 = vshll.u32 %v726_v4, %v94_v51  ;;  %vm112_vm9 = vcmp.lt.s32.totalorder %v93_v50, 1  ;;  %vm113_vm10 = vcmp.lt.s32.totalorder %v93_v50, 2 }
  0x28   :  { %v96_v7 = vshrl.u32 %v722_v59, %v95_v58  ;;  %v98_v8 = vshrl.u32 %v723_v61, %v95_v58  ;;  %v101_v9 = vshrl.u32 %v724_v63, %v95_v58  ;;  %v104_v10 = vshrl.u32 %v725_v2, %v95_v58 }
  0x29   :  { %v107_v11 = vshrl.u32 %v726_v4, %v95_v58  ;;  %v110_v13 = vshrl.u32 %v727_v12, %v95_v58  ;;  %vm115_vm11 = vcmp.lt.s32.totalorder %v93_v50, 4  ;;  %v199_v17 = vsub.s32 32, %v198_v54 }
  0x2a   :  { %v99_v14 = vor.u32 %v98_v8, %v97_v60  ;;  %v102_v15 = vor.u32 %v101_v9, %v100_v62  ;;  %v105_v16 = vor.u32 %v104_v10, %v103_v1  ;;  %vm114_vm12 = vcmp.lt.s32.totalorder %v93_v50, 3 }
  0x2b   :  { %v108_v18 = vor.u32 %v107_v11, %v106_v3  ;;  %v111_v19 = vor.u32 %v110_v13, %v109_v5  ;;  %v201_v21 = vshll.u32 %v722_v59, %v198_v54  ;;  %v204_v34 = vshll.u32 %v723_v61, %v198_v54 }
  0x2c   :  { %v116_v22 = vsel %vm112_vm9, %v96_v7, %v99_v14  ;;  %v117_v26 = vsel %vm115_vm11, %v105_v16, 2102212464  ;;  %v120_v28 = vsel %vm112_vm9, %v99_v14, %v102_v15  ;;  %v124_v29 = vsel %vm112_vm9, %v102_v15, %v105_v16 }
  0x2d   :  { %v118_v30 = vsel %vm114_vm12, %v102_v15, %v117_v26  ;;  %v121_v31 = vsel %vm115_vm11, %v108_v18, 920167782  ;;  %v125_v33 = vsel %vm115_vm11, %v111_v19, 1326507024  ;;  %v200_v38 = vshrl.u32 %v722_v59, %v199_v17 }
  0x2e   :  { %v122_v35 = vsel %vm114_vm12, %v105_v16, %v121_v31  ;;  %v126_v36 = vsel %vm114_vm12, %v108_v18, %v125_v33  ;;  %v202_v39 = vshrl.u32 %v723_v61, %v199_v17  ;;  %v119_v40 = vsel %vm113_vm10, %v116_v22, %v118_v30 }
  0x2f   :  { %v123_v41 = vsel %vm113_vm10, %v120_v28, %v122_v35  ;;  %v127_v42 = vsel %vm113_vm10, %v124_v29, %v126_v36  ;;  %v205_v43 = vshrl.u32 %v724_v63, %v199_v17  ;;  %v207_v60 = vshll.u32 %v724_v63, %v198_v54 }
  0x30   :  { %v825_v44 = vmul.u32.u64.low %v789_v52, %v127_v42  ;;  %v826_v46 = vmul.u32.u64.high %v789_v52, %v127_v42, %v825_v44  ;;  %v829_v49 = vmul.u32.u64.low %v789_v52, %v123_v41  ;;  %v830_v51 = vmul.u32.u64.high %v789_v52, %v123_v41, %v829_v49 }
  0x31   :  { %v203_v53 = vor.u32 %v202_v39, %v201_v21  ;;  %v206_v58 = vor.u32 %v205_v43, %v204_v34  ;;  %v208_v62 = vshrl.u32 %v725_v2, %v199_v17  ;;  %v210_v50 = vshll.u32 %v725_v2, %v198_v54 }
  0x32   :  { %v211_v1 = vshrl.u32 %v726_v4, %v199_v17  ;;  %v213_v3 = vshll.u32 %v726_v4, %v198_v54  ;;  %v214_v5 = vshrl.u32 %v727_v12, %v199_v17  ;;  %v135_v7 = vmul.u32 %v789_v52, %v119_v40 }
  0x33   :  { %v209_v8 = vor.u32 %v208_v62, %v207_v60  ;;  %vm216_vm14 = vcmp.lt.s32.totalorder %v804_v6, 1  ;;  %vm217_vm15 = vcmp.lt.s32.totalorder %v804_v6, 2  ;;  %vm137_vm1 = vc.u32 %v826_v46, %v829_v49 }
  0x34   :  { %v138_v9 = vadd.s32 1, %v830_v51  ;;  %v212_v10 = vor.u32 %v211_v1, %v210_v50  ;;  %vm218_vm3 = vcmp.lt.s32.totalorder %v804_v6, 3  ;;  %v215_v11 = vor.u32 %v214_v5, %v213_v3 }
  0x35   :  { %vm219_vm4 = vcmp.lt.s32.totalorder %v804_v6, 4  ;;  %v220_v54 = vsel %vm216_vm14, %v200_v38, %v203_v53  ;;  %v224_v13 = vsel %vm216_vm14, %v203_v53, %v206_v58  ;;  %v228_v16 = vsel %vm216_vm14, %v206_v58, %v209_v8 }
  0x36   :  { %v139_v52 = vsel %vm137_vm1, %v138_v9, %v830_v51  ;;  %v221_v14 = vsel %vm219_vm4, %v209_v8, 2102212464  ;;  %v225_v15 = vsel %vm219_vm4, %v212_v10, 920167782  ;;  %v229_v21 = vsel %vm219_vm4, %v215_v11, 1326507024 }
  0x37   :  { %v140_v17 = vadd.s32 %v139_v52, %v135_v7  ;;  %v222_v18 = vsel %vm218_vm3, %v206_v58, %v221_v14  ;;  %v226_v19 = vsel %vm218_vm3, %v209_v8, %v225_v15  ;;  %v230_v28 = vsel %vm218_vm3, %v212_v10, %v229_v21 }
  0x38   :  { %v223_v22 = vsel %vm217_vm15, %v220_v54, %v222_v18  ;;  %v227_v26 = vsel %vm217_vm15, %v224_v13, %v226_v19  ;;  %v300_v29 = vsel %vm299_vm13, %v797_v57, 0  ;;  %v231_v31 = vsel %vm217_vm15, %v228_v16, %v230_v28 }
  0x39   :  { %v141_v30 = vadd.s32 536870912, %v140_v17  ;;  %v858_v33 = vmul.u32.u64.low %v791_v55, %v227_v26  ;;  %v859_v34 = vmul.u32.u64.high %v791_v55, %v227_v26, %v858_v33  ;;  %v61_v35 = vrot.slane %v782_v47, 7 }
  0x3a   :  { %v864_v36 = vmul.u32.u64.low %v791_v55, %v231_v31  ;;  %v865_v38 = vmul.u32.u64.high %v791_v55, %v231_v31, %v864_v36  ;;  %v392_v39 = vand.u32 2147483647, %v787_v48  ;;  %v296_v57 = vor.u32 8388608, %v795_v56 }
  0x3b   :  { %v142_v40 = vshrl.u32 %v141_v30, 30  ;;  %v302_v41 = vand.u32 31, %v300_v29  ;;  %v239_v6 = vmul.u32 %v791_v55, %v223_v22  ;;  %v242_v43 = vadd.s32 1, %v859_v34 }
  0x3c   :  { %v874_v47 = vsel %vm67_vm2, %v58_v37, %v61_v35  ;;  %vm241_vm5 = vc.u32 %v865_v38, %v858_v33  ;;  %v395_v51 = vand.u32 2139095040, %v787_v48  ;;  %v881_v56 = vand.u32 8388607, %v392_v39 }
  0x3d   :  { %v143_v42 = vshll.u32 %v142_v40, 30  ;;  %v303_v44 = vsub.s32 32, %v302_v41  ;;  %v243_v53 = vsel %vm241_vm5, %v242_v43, %v859_v34  ;;  %v887_v58 = vshrl.u32 %v300_v29, 5 }
  0x3e   :  { %v889_v32 = vshll.u32 %v296_v57, 8  ;;  %v244_v37 = vadd.s32 %v243_v53, %v239_v6  ;;  %v305_v60 = vshll.u32 %v722_v59, %v302_v41  ;;  %v308_v50 = vshll.u32 %v723_v61, %v302_v41 }
  0x3f   :  { %v884_v55 = vsub.s32 %v140_v17, %v143_v42  ;;  %v306_v62 = vshrl.u32 %v723_v61, %v303_v44  ;;  %v309_v3 = vshrl.u32 %v724_v63, %v303_v44  ;;  %v311_v5 = vshll.u32 %v724_v63, %v302_v41 }
  0x40   :  { %v312_v7 = vshrl.u32 %v725_v2, %v303_v44  ;;  %v136_v8 = vadd.s32 %v829_v49, %v826_v46  ;;  %v245_v9 = vadd.s32 536870912, %v244_v37  ;;  %v314_v10 = vshll.u32 %v725_v2, %v302_v41 }
  0x41   :  { %v146_v1 = vsub.s32 0, %v884_v55  ;;  %v396_v11 = vshrl.u32 %v395_v51, 23  ;;  %v166_v13 = vsub.s32 4, %v142_v40  ;;  %v315_v52 = vshrl.u32 %v726_v4, %v303_v44 }
  0x42   :  { %vm323_vm2 = vcmp.lt.s32.totalorder %v887_v58, 4  ;;  %v904_v14 = vshrl.u32 %v245_v9, 30  ;;  %v304_v15 = vshrl.u32 %v722_v59, %v303_v44  ;;  %v317_v16 = vshll.u32 %v726_v4, %v302_v41 }
  0x43   :  { %v631_v54 = vmin.u32 %v146_v1, %v884_v55  ;;  %v318_v17 = vshrl.u32 %v727_v12, %v303_v44  ;;  %v307_v49 = vor.u32 %v306_v62, %v305_v60  ;;  %v310_v18 = vor.u32 %v309_v3, %v308_v50 }
  0x44   :  { %v313_v19 = vor.u32 %v312_v7, %v311_v5  ;;  %v247_v21 = vshll.u32 %v904_v14, 30  ;;  %v316_v22 = vor.u32 %v315_v52, %v314_v10  ;;  %vm320_vm7 = vcmp.lt.s32.totalorder %v887_v58, 1 }
  0x45   :  { %v148_v46 = vclz %v631_v54  ;;  %vm322_vm8 = vcmp.lt.s32.totalorder %v887_v58, 3  ;;  %v319_v28 = vor.u32 %v318_v17, %v317_v16  ;;  %v642_v30 = vadd.s32 4294967169, %v396_v11 }
  0x46   :  { %v325_v29 = vsel %vm323_vm2, %v313_v19, 2102212464  ;;  %v167_v31 = vsel %vm82_vm6, %v166_v13, %v142_v40  ;;  %v916_v34 = vsub.s32 %v244_v37, %v247_v21  ;;  %vm321_vm9 = vcmp.lt.s32.totalorder %v887_v58, 2 }
  0x47   :  { %v632_v26 = vadd.s32 4294967294, %v148_v46  ;;  %v329_v35 = vsel %vm323_vm2, %v316_v22, 920167782  ;;  %v324_v36 = vsel %vm320_vm7, %v304_v15, %v307_v49  ;;  %v328_v57 = vsel %vm320_vm7, %v307_v49, %v310_v18 }
  0x48   :  { %v330_v41 = vsel %vm322_vm8, %v313_v19, %v329_v35  ;;  %v250_v40 = vsub.s32 0, %v916_v34  ;;  %v326_v42 = vsel %vm322_vm8, %v310_v18, %v325_v29  ;;  %v332_v43 = vsel %vm320_vm7, %v310_v18, %v313_v19 }
  0x49   :  { %vm633_vm10 = vcmp.lt.s32.totalorder %v632_v26, 0  ;;  %v333_v37 = vsel %vm323_vm2, %v319_v28, 1326507024  ;;  %vm937_vm11 = vcmp.le.f32.partialorder %v80_v25, 0.7853982  ;;  %vm186_vm12 = vcmp.lt.s32.totalorder %v762_v23, 0 }
  0x4a   :  { %v151_v6 = vsel %vm633_vm10, 0, %v632_v26  ;;  %v635_v62 = vmin.u32 %v250_v40, %v916_v34  ;;  %v331_v50 = vsel %vm321_vm9, %v328_v57, %v330_v41  ;;  %v402_v7 = vadd.s32 1, %v642_v30 }
  0x4b   :  { %v152_v44 = vsub.s32 32, %v151_v6  ;;  %v153_v51 = vshll.u32 %v884_v55, %v151_v6  ;;  %v156_v53 = vsub.s32 4294967266, %v151_v6  ;;  %v334_v55 = vsel %vm322_vm8, %v316_v22, %v333_v37 }
  0x4c   :  { %v335_v5 = vsel %vm321_vm9, %v332_v43, %v334_v55  ;;  %v169_v25 = vsel %vm937_vm11, 0, %v167_v31  ;;  %v252_v9 = vclz %v635_v62  ;;  %v327_v10 = vsel %vm321_vm9, %v324_v36, %v326_v42 }
  0x4d   :  { %v154_v1 = vshrl.u32 %v136_v8, %v152_v44  ;;  %v157_v3 = vadd.s32 127, %v156_v53  ;;  %v400_v11 = vor.u32 8388608, %v881_v56  ;;  %vm403_vm13 = vcmp.gt.s32.totalorder %v402_v7, 0 }
  0x4e   :  { %v955_v52 = vmul.u32.u64.low %v889_v32, %v335_v5  ;;  %v956_v15 = vmul.u32.u64.high %v889_v32, %v335_v5, %v955_v52  ;;  %v636_v8 = vadd.s32 4294967294, %v252_v9  ;;  %v270_v58 = vsub.s32 4, %v904_v14 }
  0x4f   :  { %v155_v54 = vor.u32 %v154_v1, %v153_v51  ;;  %v158_v13 = vshll.u32 %v157_v3, 23  ;;  %v959_v16 = vmul.u32.u64.low %v889_v32, %v331_v50  ;;  %v960_v17 = vmul.u32.u64.high %v889_v32, %v331_v50, %v959_v16 }
  0x50   :  { %v404_v18 = vsel %vm403_vm13, %v402_v7, 0  ;;  %v964_v19 = vadd.s32 3, %v169_v25  ;;  %v240_v21 = vadd.s32 %v858_v33, %v865_v38  ;;  %vm637_vm14 = vcmp.lt.s32.totalorder %v636_v8, 0 }
  0x51   :  { %v159_v46 = vor.u32 4788187, %v158_v13  ;;  %v162_v49 = vcvt.s32.f32 %v155_v54  ;;  %v406_v22 = vand.u32 31, %v404_v18  ;;  %v255_v28 = vsel %vm637_vm14, 0, %v636_v8 }
  0x52   :  { %v343_v29 = vmul.u32 %v889_v32, %v327_v10  ;;  %vm345_vm15 = vc.u32 %v956_v15, %v959_v16  ;;  %vm973_vm1 = vcmp.le.f32.partialorder %v184_v27, 0.7853982  ;;  %v256_v31 = vsub.s32 32, %v255_v28 }
  0x53   :  { %v160_v26 = vand.u32 2147483647, %v159_v46  ;;  %v257_v35 = vshll.u32 %v916_v34, %v255_v28  ;;  %v260_v36 = vsub.s32 4294967266, %v255_v28  ;;  %v346_v33 = vadd.s32 1, %v960_v17 }
  0x54   :  { %v271_v32 = vsel %vm186_vm12, %v270_v58, %v904_v14  ;;  %v982_v57 = vshrl.u32 %v404_v18, 5  ;;  %v407_v41 = vsub.s32 32, %v406_v22  ;;  %v258_v6 = vshrl.u32 %v240_v21, %v256_v31 }
  0x55   :  { %v163_v38 = vmul.f32 %v162_v49, %v160_v26  ;;  %v261_v40 = vadd.s32 127, %v260_v36  ;;  %v347_v27 = vsel %vm345_vm15, %v346_v33, %v960_v17  ;;  %v409_v42 = vshll.u32 %v722_v59, %v406_v22 }
  0x56   :  { %v348_v44 = vadd.s32 %v347_v27, %v343_v29  ;;  %v410_v34 = vshrl.u32 %v723_v61, %v407_v41  ;;  %v412_v51 = vshll.u32 %v723_v61, %v406_v22  ;;  %v259_v53 = vor.u32 %v258_v6, %v257_v35 }
  0x57   :  { %v164_v43 = vxor.u32 2147483648, %v163_v38  ;;  %v262_v37 = vshll.u32 %v261_v40, 23  ;;  %v413_v62 = vshrl.u32 %v724_v63, %v407_v41  ;;  %v415_v14 = vshll.u32 %v724_v63, %v406_v22 }
  0x58   :  { %v349_v55 = vadd.s32 536870912, %v348_v44  ;;  %v416_v1 = vshrl.u32 %v725_v2, %v407_v41  ;;  %v418_v3 = vshll.u32 %v725_v2, %v406_v22  ;;  %v266_v25 = vcvt.s32.f32 %v259_v53 }
  0x59   :  { %v165_v50 = vsel %vm82_vm6, %v164_v43, %v163_v38  ;;  %v263_v7 = vor.u32 4788187, %v262_v37  ;;  %v411_v9 = vor.u32 %v410_v34, %v409_v42  ;;  %v414_v54 = vor.u32 %v413_v62, %v412_v51 }
  0x5a   :  { %v168_v5 = vsel %vm937_vm11, %v760_v20, %v165_v50  ;;  %v997_v10 = vshrl.u32 %v349_v55, 30  ;;  %v419_v13 = vshrl.u32 %v726_v4, %v407_v41  ;;  %v421_v8 = vshll.u32 %v726_v4, %v406_v22 }
  0x5b   :  { %677 = vcosq.f32 %v168_v5  ;;  %v264_v52 = vand.u32 2147483647, %v263_v7  ;;  %v422_v17 = vshrl.u32 %v727_v12, %v407_v41  ;;  %v273_v46 = vsel %vm973_vm1, 0, %v271_v32 }
  0x5c   :  { %679 = vsinq.f32 %v168_v5  ;;  %v351_v60 = vshll.u32 %v997_v10, 30  ;;  %v420_v49 = vor.u32 %v419_v13, %v418_v3  ;;  %vm424_vm3 = vcmp.lt.s32.totalorder %v982_v57, 1 }
  0x5d   :  { %v267_v58 = vmul.f32 %v266_v25, %v264_v52  ;;  %v408_v18 = vshrl.u32 %v722_v59, %v407_v41  ;;  %v417_v21 = vor.u32 %v416_v1, %v415_v14  ;;  %v1009_v26 = vshll.u32 %v400_v11, 8 }
  0x5e   :  { %v1011_v28 = vsub.s32 %v348_v44, %v351_v60  ;;  %v423_v22 = vor.u32 %v422_v17, %v421_v8  ;;  %vm426_vm4 = vcmp.lt.s32.totalorder %v982_v57, 3  ;;  %vm427_vm5 = vcmp.lt.s32.totalorder %v982_v57, 4 }
  0x5f   :  { %vm172_vm6 = vweird.f32 %v760_v20  ;;  %v268_v29 = vxor.u32 2147483648, %v267_v58  ;;  %vm425_vm2 = vcmp.lt.s32.totalorder %v982_v57, 2  ;;  %v429_v31 = vsel %vm427_vm5, %v417_v21, 2102212464 }
  0x60   :  { %v432_v56 = vsel %vm424_vm3, %v411_v9, %v414_v54  ;;  %v174_v11 = vand.u32 3, %v964_v19  ;;  %v277_v35 = vadd.s32 3, %v273_v46  ;;  %v354_v36 = vsub.s32 0, %v1011_v28 }
  0x61   :  { %v433_v33 = vsel %vm427_vm5, %v420_v49, 920167782  ;;  %v269_v38 = vsel %vm186_vm12, %v268_v29, %v267_v58  ;;  %v428_v32 = vsel %vm424_vm3, %v408_v18, %v411_v9  ;;  %v430_v41 = vsel %vm426_vm4, %v414_v54, %v429_v31 }
  0x62   :  { %v434_v6 = vsel %vm426_vm4, %v417_v21, %v433_v33  ;;  %v272_v19 = vsel %vm973_vm1, %v762_v23, %v269_v38  ;;  %vm290_vm7 = vcmp.lt.s32.totalorder %v764_v24, 0  ;;  %v639_v40 = vmin.u32 %v354_v36, %v1011_v28 }
  0x63   :  { %v435_v27 = vsel %vm425_vm2, %v432_v56, %v434_v6  ;;  %v436_v42 = vsel %vm424_vm3, %v414_v54, %v417_v21  ;;  %681 = vcosq.f32 %v272_v19  ;;  %v437_v43 = vsel %vm427_vm5, %v423_v22, 1326507024 }
  0x64   :  { %v1045_v44 = vmul.u32.u64.low %v1009_v26, %v435_v27  ;;  %v1046_v34 = vmul.u32.u64.high %v1009_v26, %v435_v27, %v1045_v44  ;;  %vm175_vm8 = vcmp.lt.s32.totalorder %v174_v11, 2  ;;  %vm179_vm9 = vcmp.eq.s32.totalorder %v174_v11, 2 }
  0x65   :  { %v678_v30 = vpop.eup %677  ;;  %683 = vsinq.f32 %v272_v19  ;;  %v356_v51 = vclz %v639_v40  ;;  %vm176_vm10 = vcmp.eq.s32.totalorder %v174_v11, 0  ;;  %v278_v62 = vand.u32 3, %v277_v35 }
  0x66   :  { %v680_v53 = vpop.eup %679  ;;  %v180_v37 = vxor.u32 2147483648, %v678_v30  ;;  %v438_v14 = vsel %vm426_vm4, %v420_v49, %v437_v43  ;;  %v431_v1 = vsel %vm425_vm2, %v428_v32, %v430_v41  ;;  %v374_v7 = vsub.s32 4, %v997_v10 }
  0x67   :  { %v177_v50 = vxor.u32 2147483648, %v680_v53  ;;  %v640_v55 = vadd.s32 4294967294, %v356_v51  ;;  %v439_v3 = vsel %vm425_vm2, %v436_v42, %v438_v14  ;;  %v344_v13 = vadd.s32 %v959_v16, %v956_v15 }
  0x68   :  { %v181_v5 = vsel %vm179_vm9, %v180_v37, %v680_v53  ;;  %v1057_v25 = vmul.u32.u64.low %v1009_v26, %v439_v3  ;;  %v1058_v9 = vmul.u32.u64.high %v1009_v26, %v439_v3, %v1057_v25  ;;  %v450_v52 = vadd.s32 1, %v1046_v34 }
  0x69   :  { %v178_v54 = vsel %vm176_vm10, %v678_v30, %v177_v50  ;;  %vm641_vm11 = vcmp.lt.s32.totalorder %v640_v55, 0  ;;  %v447_v57 = vmul.u32 %v1009_v26, %v431_v1  ;;  %v499_v46 = vand.u32 2139095040, %v874_v47 }
  0x6a   :  { %v182_v8 = vsel %vm175_vm8, %v178_v54, %v181_v5  ;;  %v359_v17 = vsel %vm641_vm11, 0, %v640_v55  ;;  %vm1073_vm12 = vcmp.le.f32.partialorder %v288_v45, 0.7853982  ;;  %v375_v16 = vsel %vm290_vm7, %v374_v7, %v997_v10 }
  0x6b   :  { %v1068_v60 = vsel %vm172_vm6, nan, %v182_v8  ;;  %v360_v49 = vsub.s32 32, %v359_v17  ;;  %v361_v58 = vshll.u32 %v1011_v28, %v359_v17  ;;  %v364_v18 = vsub.s32 4294967266, %v359_v17 }
  0x6c   :  { %vm449_vm13 = vc.u32 %v1058_v9, %v1045_v44  ;;  %v500_v20 = vshrl.u32 %v499_v46, 23  ;;  %vm280_vm14 = vcmp.eq.s32.totalorder %v278_v62, 0  ;;  %vm283_vm15 = vcmp.eq.s32.totalorder %v278_v62, 2 }
  0x6d   :  { %v362_v21 = vshrl.u32 %v344_v13, %v360_v49  ;;  %v365_v26 = vadd.s32 127, %v364_v18  ;;  %v451_v28 = vsel %vm449_vm13, %v450_v52, %v1046_v34  ;;  %v682_v22 = vpop.eup %681  ;;  %v605_v31 = vrot.slane %v1068_v60, 5 }
  0x6e   :  { %v452_v29 = vadd.s32 %v451_v28, %v447_v57  ;;  %v646_v45 = vadd.s32 4294967169, %v500_v20  ;;  %v284_v11 = vxor.u32 2147483648, %v682_v22  ;;  %v377_v10 = vsel %vm1073_vm12, 0, %v375_v16 }
  0x6f   :  { %v684_v56 = vpop.eup %683  ;;  %v363_v35 = vor.u32 %v362_v21, %v361_v58  ;;  %v366_v36 = vshll.u32 %v365_v26, 23  ;;  %v619_v41 = vsel %vm63_vm0, %v750_v0, %v605_v31  ;;  %vm279_vm1 = vcmp.lt.s32.totalorder %v278_v62, 2 }
  0x70   :  { %v281_v33 = vxor.u32 2147483648, %v684_v56  ;;  %v453_v38 = vadd.s32 536870912, %v452_v29  ;;  %v506_v32 = vadd.s32 1, %v646_v45  ;;  %v285_v6 = vsel %vm283_vm15, %v284_v11, %v684_v56  ;;  %620 = vst [vmem:[%s1192_s1] sm:$0xff] %v619_v41 }
  0x71   :  { %v367_v19 = vor.u32 4788187, %v366_v36  ;;  %v370_v40 = vcvt.s32.f32 %v363_v35  ;;  %v496_v43 = vand.u32 2147483647, %v874_v47  ;;  %v381_v30 = vadd.s32 3, %v377_v10 }
  0x72   :  { %v282_v27 = vsel %vm280_vm14, %v682_v22, %v281_v33  ;;  %v1094_v42 = vshrl.u32 %v453_v38, 30  ;;  %vm507_vm3 = vcmp.gt.s32.totalorder %v506_v32, 0  ;;  %vm276_vm4 = vweird.f32 %v762_v23 }
  0x73   :  { %v368_v34 = vand.u32 2147483647, %v367_v19  ;;  %v508_v51 = vsel %vm507_vm3, %v506_v32, 0  ;;  %v286_v0 = vsel %vm279_vm1, %v282_v27, %v285_v6  ;;  %v503_v62 = vand.u32 8388607, %v496_v43 }
  0x74   :  { %v455_v53 = vshll.u32 %v1094_v42, 30  ;;  %v510_v14 = vand.u32 31, %v508_v51  ;;  %v1103_v55 = vsel %vm276_vm4, nan, %v286_v0  ;;  %v1105_v3 = vand.u32 3, %v381_v30 }
  0x75   :  { %v371_v37 = vmul.f32 %v370_v40, %v368_v34  ;;  %v509_v25 = vshrl.u32 %v508_v51, 5  ;;  %v504_v49 = vor.u32 8388608, %v503_v62  ;;  %v448_v18 = vadd.s32 %v1045_v44, %v1058_v9 }
  0x76   :  { %v1099_v50 = vsub.s32 %v452_v29, %v455_v53  ;;  %v511_v5 = vsub.s32 32, %v510_v14  ;;  %v513_v23 = vshll.u32 %v722_v59, %v510_v14  ;;  %v516_v54 = vshll.u32 %v723_v61, %v510_v14 }
  0x77   :  { %v372_v1 = vxor.u32 2147483648, %v371_v37  ;;  %v519_v17 = vshll.u32 %v724_v63, %v510_v14  ;;  %v522_v16 = vshll.u32 %v725_v2, %v510_v14  ;;  %v525_v28 = vshll.u32 %v726_v4, %v510_v14 }
  0x78   :  { %v458_v7 = vsub.s32 0, %v1099_v50  ;;  %v514_v52 = vshrl.u32 %v723_v61, %v511_v5  ;;  %v517_v8 = vshrl.u32 %v724_v63, %v511_v5  ;;  %v520_v58 = vshrl.u32 %v725_v2, %v511_v5 }
  0x79   :  { %v373_v13 = vsel %vm290_vm7, %v372_v1, %v371_v37  ;;  %v606_v61 = vrot.slane %v1103_v55, 5  ;;  %v523_v15 = vshrl.u32 %v726_v4, %v511_v5  ;;  %vm528_vm5 = vcmp.lt.s32.totalorder %v509_v25, 1 }
  0x7a   :  { %v376_v57 = vsel %vm1073_vm12, %v764_v24, %v373_v13  ;;  %v643_v46 = vmin.u32 %v458_v7, %v1099_v50  ;;  %v515_v63 = vor.u32 %v514_v52, %v513_v23  ;;  %v518_v21 = vor.u32 %v517_v8, %v516_v54 }
  0x7b   :  { %685 = vcosq.f32 %v376_v57  ;;  %v521_v26 = vor.u32 %v520_v58, %v519_v17  ;;  %v526_v29 = vshrl.u32 %v727_v12, %v511_v5  ;;  %vm531_vm6 = vcmp.lt.s32.totalorder %v509_v25, 4 }
  0x7c   :  { %687 = vsinq.f32 %v376_v57  ;;  %v460_v20 = vclz %v643_v46  ;;  %v544_v45 = vshll.u32 %v504_v49, 8  ;;  %v512_v44 = vshrl.u32 %v722_v59, %v511_v5 }
  0x7d   :  { %v524_v2 = vor.u32 %v523_v15, %v522_v16  ;;  %vm529_vm2 = vcmp.lt.s32.totalorder %v509_v25, 2  ;;  %vm530_vm7 = vcmp.lt.s32.totalorder %v509_v25, 3  ;;  %v527_v9 = vor.u32 %v526_v29, %v525_v28 }
  0x7e   :  { %v644_v22 = vadd.s32 4294967294, %v460_v20  ;;  %v533_v56 = vsel %vm531_vm6, %v521_v26, 2102212464  ;;  %v536_v11 = vsel %vm528_vm5, %v515_v63, %v518_v21  ;;  %v540_v36 = vsel %vm528_vm5, %v518_v21, %v521_v26 }
  0x7f   :  { %v537_v4 = vsel %vm531_vm6, %v524_v2, 920167782  ;;  %v607_v59 = vsel %vm63_vm0, %v605_v31, %v606_v61  ;;  %v532_v32 = vsel %vm528_vm5, %v512_v44, %v515_v63  ;;  %v534_v41 = vsel %vm530_vm7, %v518_v21, %v533_v56 }
  0x80   :  { %vm645_vm8 = vcmp.lt.s32.totalorder %v644_v22, 0  ;;  %v538_v38 = vsel %vm530_vm7, %v521_v26, %v537_v4  ;;  %621 = vst [vmem:[%s1192_s1 + $0x8] sm:$0xff] %v607_v59  ;;  %v541_v60 = vsel %vm531_vm6, %v527_v9, 1326507024  ;;  %vm384_vm9 = vcmp.eq.s32.totalorder %v1105_v3, 0 }
  0x81   :  { %v463_v35 = vsel %vm645_vm8, 0, %v644_v22  ;;  %v539_v6 = vsel %vm529_vm2, %v536_v11, %v538_v38  ;;  %v542_v40 = vsel %vm530_vm7, %v524_v2, %v541_v60  ;;  %vm387_vm10 = vcmp.eq.s32.totalorder %v1105_v3, 2 }
  0x82   :  { %v464_v12 = vsub.s32 32, %v463_v35  ;;  %v465_v10 = vshll.u32 %v1099_v50, %v463_v35  ;;  %v468_v33 = vsub.s32 4294967266, %v463_v35  ;;  %v543_v34 = vsel %vm529_vm2, %v540_v36, %v542_v40 }
  0x83   :  { %v1150_v30 = vmul.u32.u64.low %v544_v45, %v539_v6  ;;  %v1151_v51 = vmul.u32.u64.high %v544_v45, %v539_v6, %v1150_v30  ;;  %v535_v50 = vsel %vm529_vm2, %v532_v32, %v534_v41  ;;  %vm383_vm11 = vcmp.lt.s32.totalorder %v1105_v3, 2 }
  0x84   :  { %v466_v31 = vshrl.u32 %v448_v18, %v464_v12  ;;  %v469_v19 = vadd.s32 127, %v468_v33  ;;  %v1155_v1 = vmul.u32.u64.low %v544_v45, %v543_v34  ;;  %v1156_v5 = vmul.u32.u64.high %v544_v45, %v543_v34, %v1155_v1 }
  0x85   :  { %v686_v27 = vpop.eup %685  ;;  %vm380_vm12 = vweird.f32 %v764_v24  ;;  %v551_v52 = vmul.u32 %v544_v45, %v535_v50  ;;  %v554_v8 = vadd.s32 1, %v1151_v51  ;;  %v478_v57 = vsub.s32 4, %v1094_v42 }
  0x86   :  { %v688_v0 = vpop.eup %687  ;;  %v388_v53 = vxor.u32 2147483648, %v686_v27  ;;  %v467_v37 = vor.u32 %v466_v31, %v465_v10  ;;  %v470_v14 = vshll.u32 %v469_v19, 23  ;;  %vm553_vm13 = vc.u32 %v1156_v5, %v1150_v30 }
  0x87   :  { %v385_v62 = vxor.u32 2147483648, %v688_v0  ;;  %v555_v58 = vsel %vm553_vm13, %v554_v8, %v1151_v51  ;;  %vm394_vm14 = vcmp.lt.s32.totalorder %v787_v48, 0  ;;  %vm393_vm15 = vcmp.le.f32.partialorder %v392_v39, 0.7853982 }
  0x88   :  { %v389_v7 = vsel %vm387_vm10, %v388_v53, %v688_v0  ;;  %v471_v23 = vor.u32 4788187, %v470_v14  ;;  %v474_v54 = vcvt.s32.f32 %v467_v37  ;;  %v556_v18 = vadd.s32 %v555_v58, %v551_v52 }
  0x89   :  { %v386_v13 = vsel %vm384_vm9, %v686_v27, %v385_v62  ;;  %v479_v16 = vsel %vm394_vm14, %v478_v57, %v1094_v42  ;;  %vm484_vm5 = vweird.f32 %v787_v48  ;;  %v552_v4 = vadd.s32 %v1150_v30, %v1156_v5 }
  0x8a   :  { %v390_v17 = vsel %vm383_vm11, %v386_v13, %v389_v7  ;;  %v472_v25 = vand.u32 2147483647, %v471_v23  ;;  %v557_v63 = vadd.s32 536870912, %v556_v18  ;;  %v481_v15 = vsel %vm393_vm15, 0, %v479_v16 }
  0x8b   :  { %v391_v46 = vsel %vm380_vm12, nan, %v390_v17  ;;  %v485_v22 = vadd.s32 3, %v481_v15  ;;  %vm498_vm2 = vcmp.lt.s32.totalorder %v874_v47, 0  ;;  %vm497_vm7 = vcmp.le.f32.partialorder %v496_v43, 0.7853982 }
  0x8c   :  { %v475_v49 = vmul.f32 %v474_v54, %v472_v25  ;;  %v608_v24 = vrot.slane %v391_v46, 5  ;;  %v558_v28 = vshrl.u32 %v557_v63, 30  ;;  %vm588_vm11 = vweird.f32 %v874_v47 }
  0x8d   :  { %v486_v45 = vand.u32 3, %v485_v22 }
  0x8e   :  { %v476_v3 = vxor.u32 2147483648, %v475_v49  ;;  %v609_v20 = vsel %vm63_vm0, %v606_v61, %v608_v24  ;;  %v559_v39 = vshll.u32 %v558_v28, 30  ;;  %v582_v30 = vsub.s32 4, %v558_v28 }
  0x8f   :  { %622 = vst [vmem:[%s1192_s1 + $0x10] sm:$0xff] %v609_v20  ;;  %vm491_vm1 = vcmp.eq.s32.totalorder %v486_v45, 2  ;;  %vm488_vm3 = vcmp.eq.s32.totalorder %v486_v45, 0  ;;  %vm487_vm4 = vcmp.lt.s32.totalorder %v486_v45, 2 }
  0x90   :  { %v477_v21 = vsel %vm394_vm14, %v476_v3, %v475_v49  ;;  %v560_v29 = vsub.s32 %v556_v18, %v559_v39  ;;  %v583_v53 = vsel %vm498_vm2, %v582_v30, %v558_v28 }
  0x91   :  { %v480_v26 = vsel %vm393_vm15, %v787_v48, %v477_v21  ;;  %v585_v50 = vsel %vm497_vm7, 0, %v583_v53 }
  0x92   :  { %689 = vcosq.f32 %v480_v26  ;;  %v562_v42 = vsub.s32 0, %v560_v29  ;;  %v589_v62 = vadd.s32 3, %v585_v50 }
  0x93   :  { %691 = vsinq.f32 %v480_v26 }
  0x94   :  { %v647_v55 = vmin.u32 %v562_v42, %v560_v29  ;;  %v590_v1 = vand.u32 3, %v589_v62 }
  0x96   :  { %v564_v44 = vclz %v647_v55  ;;  %vm595_vm8 = vcmp.eq.s32.totalorder %v590_v1, 2  ;;  %vm592_vm9 = vcmp.eq.s32.totalorder %v590_v1, 0  ;;  %vm591_vm10 = vcmp.lt.s32.totalorder %v590_v1, 2 }
  0x98   :  { %v648_v56 = vadd.s32 4294967294, %v564_v44 }
  0x9a   :  { %vm649_vm6 = vcmp.lt.s32.totalorder %v648_v56, 0 }
  0x9b   :  { %v567_v59 = vsel %vm649_vm6, 0, %v648_v56 }
  0x9c   :  { %v690_v61 = vpop.eup %689  ;;  %v568_v10 = vsub.s32 32, %v567_v59  ;;  %v569_v33 = vshll.u32 %v560_v29, %v567_v59  ;;  %v572_v38 = vsub.s32 4294967266, %v567_v59 }
  0x9d   :  { %v692_v2 = vpop.eup %691  ;;  %v492_v9 = vxor.u32 2147483648, %v690_v61 }
  0x9e   :  { %v489_v11 = vxor.u32 2147483648, %v692_v2  ;;  %v570_v41 = vshrl.u32 %v552_v4, %v568_v10  ;;  %v573_v6 = vadd.s32 127, %v572_v38 }
  0x9f   :  { %v493_v35 = vsel %vm491_vm1, %v492_v9, %v692_v2 }
  0xa0   :  { %v490_v36 = vsel %vm488_vm3, %v690_v61, %v489_v11  ;;  %v571_v31 = vor.u32 %v570_v41, %v569_v33  ;;  %v574_v19 = vshll.u32 %v573_v6, 23 }
  0xa1   :  { %v494_v12 = vsel %vm487_vm4, %v490_v36, %v493_v35 }
  0xa2   :  { %v495_v32 = vsel %vm484_vm5, nan, %v494_v12  ;;  %v575_v48 = vor.u32 4788187, %v574_v19  ;;  %v578_v27 = vcvt.s32.f32 %v571_v31 }
  0xa3   :  { %v610_v60 = vrot.slane %v495_v32, 5 }
  0xa4   :  { %v576_v34 = vand.u32 2147483647, %v575_v48 }
  0xa5   :  { %v611_v40 = vsel %vm63_vm0, %v608_v24, %v610_v60 }
  0xa6   :  { %623 = vst [vmem:[%s1192_s1 + $0x18] sm:$0xff] %v611_v40  ;;  %v579_v51 = vmul.f32 %v578_v27, %v576_v34 }
  0xa8   :  { %v580_v0 = vxor.u32 2147483648, %v579_v51 }
  0xaa   :  { %v581_v37 = vsel %vm498_vm2, %v580_v0, %v579_v51 }
  0xab   :  { %v584_v14 = vsel %vm497_vm7, %v874_v47, %v581_v37 }
  0xac   :  { %693 = vcosq.f32 %v584_v14 }
  0xad   :  { %695 = vsinq.f32 %v584_v14 }
  0xb6   :  { %v694_v5 = vpop.eup %693 }
  0xb7   :  { %v696_v7 = vpop.eup %695  ;;  %v596_v23 = vxor.u32 2147483648, %v694_v5 }
  0xb8   :  { %v593_v54 = vxor.u32 2147483648, %v696_v7 }
  0xb9   :  { %v597_v43 = vsel %vm595_vm8, %v596_v23, %v696_v7 }
  0xba   :  { %v594_v13 = vsel %vm592_vm9, %v694_v5, %v593_v54 }
  0xbb   :  { %v598_v52 = vsel %vm591_vm10, %v594_v13, %v597_v43 }
  0xbc   :  { %v599_v8 = vsel %vm588_vm11, nan, %v598_v52 }
  0xbd   :  { %v612_v17 = vrot.slane %v599_v8, 5 }
  0xbf   :  { %v613_v25 = vsel %vm63_vm0, %v610_v60, %v612_v17 }
  0xc0   :  { %624 = vst [vmem:[%s1192_s1 + $0x20] sm:$0x7f] %v613_v25 }
  0xc1   :  { %629 = vsyncpa [#allocation3], 1 }

</bundles_post_ra>
